<compile_context>
chip_gen: v5e
topology: v5e:2x2
jax: 0.10.0
libtpu: 0.0.40
codegen_flags: <defaults>
</compile_context>

<pallas_src>
import jax
import jax.numpy as jnp
from jax.experimental import pallas as pl
from jax.experimental.pallas import tpu as pltpu

HIDDEN = 32        # hidden_size
OUTPUT_SIZE = 64   # output vocabulary size
MAX_LENGTH = 20    # attention length (encoder_outputs rows)
LANES = 128
SLAB_ROWS = 5 * HIDDEN + 8   # 5 fused weight blocks (32 rows each) + 8 bias rows = 168


def attn_decoder_kernel(tok_ref,            # SMEM (T,) int32   (scalar prefetch)
                        slab_ref,           # VMEM (168, 128)   fused weights + biases
                        emb_ref,            # VMEM (V, 1, H)    embedding table
                        enc_ref,            # VMEM (L, H)       encoder outputs
                        h0_ref,             # VMEM (1, H)       initial hidden
                        out_ref,            # VMEM (1, 1, 128)  packed per-step output
                        h_scr):             # VMEM (1, H)       carried hidden
    H, L, V = HIDDEN, MAX_LENGTH, OUTPUT_SIZE
    t = pl.program_id(0)

    @pl.when(t == 0)
    def _():
        h_scr[...] = h0_ref[...]

    tok = tok_ref[t]
    x = emb_ref[tok]              # (1, H) embedded token (dropout == identity in eval)
    h = h_scr[...]                # (1, H)

    # ---- static carve-outs of the weight slab (zero runtime cost)
    Wh  = slab_ref[0:32, :]       # cols: [0:32]=W_hr^T [32:64]=W_hz^T [64:96]=W_hn^T [96:116]=W_attn_h^T
    Wx  = slab_ref[32:64, :]      # cols: [0:32]=W_comb_x^T [32:52]=W_attn_x^T
    Wgi = slab_ref[64:96, :]      # cols: [0:32]=W_ir^T [32:64]=W_iz^T [64:96]=W_in^T
    Wca = slab_ref[96:128, :]     # cols: [0:32]=W_comb_attn^T
    Wo  = slab_ref[128:160, :]    # cols: [0:64]=W_out^T
    bias = slab_ref[160:168, :]   # 8 bias rows (one vreg)
    b_h, b_x, b_gi, b_o = bias[0:1, :], bias[1:2, :], bias[2:3, :], bias[3:4, :]

    # ---- fused h-side and x-side projections (2 MXU pushes instead of 5)
    hp = jnp.dot(h, Wh, preferred_element_type=jnp.float32) + b_h    # (1, 128)
    xp = jnp.dot(x, Wx, preferred_element_type=jnp.float32) + b_x    # (1, 128)

    # ---- attention softmax over L
    a_logits = hp[:, 96:96 + L] + xp[:, 32:32 + L]                   # (1, L) incl. attn bias
    a_max = jnp.max(a_logits, axis=-1, keepdims=True)
    a_exp = jnp.exp(a_logits - a_max)
    attn_w = a_exp / jnp.sum(a_exp, axis=-1, keepdims=True)          # (1, L)

    # ---- attn_applied = attn_weights @ encoder_outputs
    applied = jnp.dot(attn_w, enc_ref[...], preferred_element_type=jnp.float32)   # (1, H)

    # ---- attn_combine(cat(x, applied)) + ReLU
    comb = xp[:, 0:H] + jnp.dot(applied, Wca, preferred_element_type=jnp.float32)[:, 0:H]
    g = jnp.maximum(comb, 0.0)                                       # (1, H) GRU input

    # ---- GRU step (PyTorch gate order r, z, n); r/z biases pre-summed into b_h
    gi = jnp.dot(g, Wgi, preferred_element_type=jnp.float32) + b_gi  # (1, 128)
    r = jax.nn.sigmoid(gi[:, 0:H] + hp[:, 0:H])
    z = jax.nn.sigmoid(gi[:, H:2 * H] + hp[:, H:2 * H])
    n = jnp.tanh(gi[:, 2 * H:3 * H] + r * hp[:, 2 * H:3 * H])        # b_in in gi, b_hn in hp
    h_new = (1.0 - z) * n + z * h                                    # (1, H)
    h_scr[...] = h_new

    # ---- output projection + log_softmax
    logits = (jnp.dot(h_new, Wo, preferred_element_type=jnp.float32) + b_o)[:, 0:V]
    l_max = jnp.max(logits, axis=-1, keepdims=True)
    shifted = logits - l_max
    logp = shifted - jnp.log(jnp.sum(jnp.exp(shifted), axis=-1, keepdims=True))   # (1, V)

    # ---- lane-dense packed output row: [logp(64) | h_new(32) | attn_w(20) | pad(12)]
    pad = jnp.zeros((1, LANES - V - H - L), jnp.float32)
    out_ref[...] = jnp.concatenate([logp, h_new, attn_w, pad], axis=1).reshape(1, 1, LANES)


def _decode_impl(tokens, hidden0, encoder_outputs, slab, emb3):
    """tokens: int32 (T,); hidden0: f32 (1,1,H); encoder_outputs: f32 (L,H).
    Returns per-step (log_probs (T,V), hidden (T,H), attn_weights (T,L))."""
    H, V, L = HIDDEN, OUTPUT_SIZE, MAX_LENGTH
    T = tokens.shape[0]
    tok = jnp.clip(tokens.astype(jnp.int32), 0, V - 1)   # keep in-kernel row read in bounds
    h0 = hidden0.reshape(1, H).astype(jnp.float32)

    grid_spec = pltpu.PrefetchScalarGridSpec(
        num_scalar_prefetch=1,
        grid=(T,),
        in_specs=[
            pl.BlockSpec((SLAB_ROWS, LANES), lambda t, tok: (0, 0)),   # fused weight slab
            pl.BlockSpec((V, 1, H), lambda t, tok: (0, 0, 0)),         # embedding table
            pl.BlockSpec((L, H), lambda t, tok: (0, 0)),               # encoder outputs
            pl.BlockSpec((1, H), lambda t, tok: (0, 0)),               # initial hidden
        ],
        out_specs=pl.BlockSpec((1, 1, LANES), lambda t, tok: (t, 0, 0)),
        scratch_shapes=[pltpu.VMEM((1, H), jnp.float32)],              # carried hidden
    )

    packed = pl.pallas_call(
        attn_decoder_kernel,
        out_shape=jax.ShapeDtypeStruct((T, 1, LANES), jnp.float32),
        grid_spec=grid_spec,
        compiler_params=pltpu.CompilerParams(dimension_semantics=("arbitrary",)),
    )(tok, slab, emb3, encoder_outputs.astype(jnp.float32), h0)

    logp_all = packed[:, 0, 0:V]
    h_all = packed[:, 0, V:V + H]
    attn_all = packed[:, 0, V + H:V + H + L]
    return logp_all, h_all, attn_all


attn_decoder_decode = jax.jit(_decode_impl)


def attn_decoder_forward(token, hidden, encoder_outputs, slab, emb3):
    """Single-step interface matching AttnDecoderRNN.forward:
    returns (log_probs (1,V), hidden (1,1,H), attn_weights (1,L))."""
    logp, h_seq, attn = attn_decoder_decode(token.reshape(1), hidden, encoder_outputs, slab, emb3)
    return logp, h_seq[-1].reshape(1, 1, HIDDEN), attn


def init_params(key):
    """PyTorch-layout parameters (Embedding, attn, attn_combine, GRU, out)."""
    H, V, L = HIDDEN, OUTPUT_SIZE, MAX_LENGTH
    ks = jax.random.split(key, 11)
    b = 1.0 / jnp.sqrt(jnp.float32(H))
    emb    = jax.random.normal(ks[0], (V, H), jnp.float32)
    attn_w = jax.random.uniform(ks[1], (L, 2 * H), jnp.float32, -b, b)
    attn_b = jax.random.uniform(ks[2], (L,), jnp.float32, -b, b)
    comb_w = jax.random.uniform(ks[3], (H, 2 * H), jnp.float32, -b, b)
    comb_b = jax.random.uniform(ks[4], (H,), jnp.float32, -b, b)
    w_ih   = jax.random.uniform(ks[5], (3 * H, H), jnp.float32, -b, b)
    w_hh   = jax.random.uniform(ks[6], (3 * H, H), jnp.float32, -b, b)
    b_ih   = jax.random.uniform(ks[7], (3 * H,), jnp.float32, -b, b)
    b_hh   = jax.random.uniform(ks[8], (3 * H,), jnp.float32, -b, b)
    out_w  = jax.random.uniform(ks[9], (V, H), jnp.float32, -b, b)
    out_b  = jax.random.uniform(ks[10], (V,), jnp.float32, -b, b)
    return (emb, attn_w, attn_b, comb_w, comb_b, w_ih, w_hh, b_ih, b_hh, out_w, out_b)


def pack_kernel_params(params):
    """Repack PyTorch-layout params into one lane-padded (168,128) slab + emb table."""
    (emb, attn_w, attn_b, comb_w, comb_b, w_ih, w_hh, b_ih, b_hh, out_w, out_b) = params
    H, V, L = HIDDEN, OUTPUT_SIZE, MAX_LENGTH

    def pad_lanes(m):
        return jnp.pad(m, ((0, 0), (0, LANES - m.shape[1])))

    # h-side fused: [W_hr^T | W_hz^T | W_hn^T | W_attn_h^T]
    Wh = pad_lanes(jnp.concatenate(
        [w_hh[0:H].T, w_hh[H:2 * H].T, w_hh[2 * H:3 * H].T, attn_w[:, H:].T], axis=1))
    # x-side fused: [W_comb_x^T | W_attn_x^T]
    Wx = pad_lanes(jnp.concatenate([comb_w[:, :H].T, attn_w[:, :H].T], axis=1))
    # GRU input-side fused: [W_ir^T | W_iz^T | W_in^T]
    Wgi = pad_lanes(jnp.concatenate(
        [w_ih[0:H].T, w_ih[H:2 * H].T, w_ih[2 * H:3 * H].T], axis=1))
    Wca = pad_lanes(comb_w[:, H:].T)        # (H, 128), cols 0:H
    Wo  = pad_lanes(out_w.T)                # (H, 128), cols 0:V

    # bias rows: r/z biases pre-summed; b_hn rides the h-side; b_in rides the gi-side
    b_h  = pad_lanes(jnp.concatenate(
        [b_ih[0:H] + b_hh[0:H], b_ih[H:2 * H] + b_hh[H:2 * H],
         b_hh[2 * H:3 * H], attn_b]).reshape(1, -1))
    b_x  = pad_lanes(comb_b.reshape(1, H))
    b_gi = pad_lanes(jnp.concatenate(
        [jnp.zeros((2 * H,), jnp.float32), b_ih[2 * H:3 * H]]).reshape(1, -1))
    b_o  = pad_lanes(out_b.reshape(1, V))
    bias = jnp.concatenate([b_h, b_x, b_gi, b_o, jnp.zeros((4, LANES), jnp.float32)], axis=0)

    slab = jnp.concatenate([Wh, Wx, Wgi, Wca, Wo, bias], axis=0).astype(jnp.float32)
    assert slab.shape == (SLAB_ROWS, LANES)
    emb3 = emb.reshape(V, 1, H).astype(jnp.float32)
    return slab, emb3


def reference_forward(token, hidden, encoder_outputs, params):
    """Pure-JAX reference of AttnDecoderRNN.forward (eval-mode dropout)."""
    (emb, attn_w, attn_b, comb_w, comb_b, w_ih, w_hh, b_ih, b_hh, out_w, out_b) = params
    H = HIDDEN
    x = emb[token[0]].reshape(1, H)
    h = hidden.reshape(1, H)
    aw = jax.nn.softmax(jnp.concatenate([x, h], axis=1) @ attn_w.T + attn_b, axis=1)
    applied = aw @ encoder_outputs
    g = jax.nn.relu(jnp.concatenate([x, applied], axis=1) @ comb_w.T + comb_b)
    gi = g @ w_ih.T + b_ih
    gh = h @ w_hh.T + b_hh
    r = jax.nn.sigmoid(gi[:, :H] + gh[:, :H])
    z = jax.nn.sigmoid(gi[:, H:2 * H] + gh[:, H:2 * H])
    n = jnp.tanh(gi[:, 2 * H:] + r * gh[:, 2 * H:])
    h_new = (1.0 - z) * n + z * h
    logp = jax.nn.log_softmax(h_new @ out_w.T + out_b, axis=1)
    return logp, h_new.reshape(1, 1, H), aw


def reference_decode(tokens, hidden, encoder_outputs, params):
    logps, hs, attns = [], [], []
    h = hidden
    for t in range(tokens.shape[0]):
        logp, h, aw = reference_forward(tokens[t:t + 1], h, encoder_outputs, params)
        logps.append(logp)
        hs.append(h.reshape(1, HIDDEN))
        attns.append(aw)
    return (jnp.concatenate(logps, 0), jnp.concatenate(hs, 0), jnp.concatenate(attns, 0))


if __name__ == "__main__":
    key = jax.random.PRNGKey(0)
    k_params, k_tok, k_hid, k_enc = jax.random.split(key, 4)

    params = init_params(k_params)
    slab, emb3 = pack_kernel_params(params)

    T = 8
    tokens = jax.random.randint(k_tok, (T,), 0, OUTPUT_SIZE, dtype=jnp.int32)
    hidden0 = 0.1 * jax.random.normal(k_hid, (1, 1, HIDDEN), jnp.float32)
    encoder_outputs = 0.5 * jax.random.normal(k_enc, (MAX_LENGTH, HIDDEN), jnp.float32)

    # --- multi-step decode (weights resident, one pallas_call for the whole sequence)
    logp_all, h_all, attn_all = attn_decoder_decode(tokens, hidden0, encoder_outputs, slab, emb3)
    logp_all = jax.block_until_ready(logp_all)
    h_all = jax.block_until_ready(h_all)
    attn_all = jax.block_until_ready(attn_all)

    logp_r, h_r, attn_r = reference_decode(tokens, hidden0, encoder_outputs, params)

    assert logp_all.shape == (T, OUTPUT_SIZE)
    assert h_all.shape == (T, HIDDEN)
    assert attn_all.shape == (T, MAX_LENGTH)
    assert jnp.allclose(logp_all, logp_r, atol=1e-4, rtol=1e-4)
    assert jnp.allclose(h_all, h_r, atol=1e-4, rtol=1e-4)
    assert jnp.allclose(attn_all, attn_r, atol=1e-4, rtol=1e-4)

    # --- single-step interface matching the PyTorch module exactly
    logp1, h1, aw1 = attn_decoder_forward(tokens[:1], hidden0, encoder_outputs, slab, emb3)
    logp1 = jax.block_until_ready(logp1)
    logp1_r, h1_r, aw1_r = reference_forward(tokens[:1], hidden0, encoder_outputs, params)
    assert logp1.shape == (1, OUTPUT_SIZE)
    assert h1.shape == (1, 1, HIDDEN)
    assert aw1.shape == (1, MAX_LENGTH)
    assert jnp.allclose(logp1, logp1_r, atol=1e-4, rtol=1e-4)
    assert jnp.allclose(h1, h1_r, atol=1e-4, rtol=1e-4)
    assert jnp.allclose(aw1, aw1_r, atol=1e-4, rtol=1e-4)

    print("KERNEL_OK")
</pallas_src>

<mosaic_0001>
module attributes {stable_mosaic.version = 11 : i64} {
  func.func @attn_decoder_kernel(%arg0: i32, %arg1: memref<8xi32, #tpu.memory_space<smem>>, %arg2: memref<168x128xf32, #tpu.memory_space<vmem>>, %arg3: memref<64x1x32xf32, #tpu.memory_space<vmem>>, %arg4: memref<20x32xf32, #tpu.memory_space<vmem>>, %arg5: memref<1x32xf32, #tpu.memory_space<vmem>>, %arg6: memref<1x1x128xf32, #tpu.memory_space<vmem>>, %arg7: memref<1x32xf32, #tpu.memory_space<vmem>>) attributes {dimension_semantics = [#tpu.dimension_semantics<arbitrary>], iteration_bounds = array<i64: 8>, scalar_prefetch = 1 : i64, scratch_operands = 1 : i64, tpu.core_type = #tpu.core_type<tc>, window_params = [{pipeline_mode = #tpu.pipeline_mode<synchronous>, transform_indices = @transform_0, window_bounds = array<i64: 168, 128>}, {pipeline_mode = #tpu.pipeline_mode<synchronous>, transform_indices = @transform_1, window_bounds = array<i64: 64, 1, 32>}, {pipeline_mode = #tpu.pipeline_mode<synchronous>, transform_indices = @transform_2, window_bounds = array<i64: 20, 32>}, {pipeline_mode = #tpu.pipeline_mode<synchronous>, transform_indices = @transform_3, window_bounds = array<i64: 1, 32>}, {transform_indices = @transform_4, window_bounds = array<i64: 1, 1, 128>}]} {
    %c0_i32 = arith.constant 0 : i32
    %0 = arith.cmpi eq, %arg0, %c0_i32 : i32
    %1 = arith.extui %0 : i1 to i32
    %c0_i32_0 = arith.constant 0 : i32
    %2 = arith.cmpi ne, %1, %c0_i32_0 : i32
    scf.if %2 {
      %c0_32 = arith.constant 0 : index
      %c0_33 = arith.constant 0 : index
      %89 = vector.load %arg5[%c0_32, %c0_33] : memref<1x32xf32, #tpu.memory_space<vmem>>, vector<1x32xf32>
      %c0_34 = arith.constant 0 : index
      %c0_35 = arith.constant 0 : index
      %90 = vector.load %arg7[%c0_34, %c0_35] : memref<1x32xf32, #tpu.memory_space<vmem>>, vector<1x32xf32>
      tpu.vector_store %arg7[%c0_34, %c0_35], %89 {strides = array<i32>} : memref<1x32xf32, #tpu.memory_space<vmem>>, vector<1x32xf32>,
    } else {
    }
    %3 = arith.index_cast %arg0 : i32 to index
    %4 = memref.load %arg1[%3] : memref<8xi32, #tpu.memory_space<smem>>
    %5 = arith.index_cast %4 : i32 to index
    %c0 = arith.constant 0 : index
    %c0_1 = arith.constant 0 : index
    %6 = vector.load %arg3[%5, %c0, %c0_1] : memref<64x1x32xf32, #tpu.memory_space<vmem>>, vector<1x1x32xf32>
    %7 = vector.shape_cast %6 : vector<1x1x32xf32> to vector<1x32xf32>
    %c0_2 = arith.constant 0 : index
    %c0_3 = arith.constant 0 : index
    %8 = vector.load %arg7[%c0_2, %c0_3] : memref<1x32xf32, #tpu.memory_space<vmem>>, vector<1x32xf32>
    %c0_4 = arith.constant 0 : index
    %c0_5 = arith.constant 0 : index
    %9 = vector.load %arg2[%c0_4, %c0_5] : memref<168x128xf32, #tpu.memory_space<vmem>>, vector<32x128xf32>
    %c32 = arith.constant 32 : index
    %c0_6 = arith.constant 0 : index
    %10 = vector.load %arg2[%c32, %c0_6] : memref<168x128xf32, #tpu.memory_space<vmem>>, vector<32x128xf32>
    %c64 = arith.constant 64 : index
    %c0_7 = arith.constant 0 : index
    %11 = vector.load %arg2[%c64, %c0_7] : memref<168x128xf32, #tpu.memory_space<vmem>>, vector<32x128xf32>
    %c96 = arith.constant 96 : index
    %c0_8 = arith.constant 0 : index
    %12 = vector.load %arg2[%c96, %c0_8] : memref<168x128xf32, #tpu.memory_space<vmem>>, vector<32x128xf32>
    %c128 = arith.constant 128 : index
    %c0_9 = arith.constant 0 : index
    %13 = vector.load %arg2[%c128, %c0_9] : memref<168x128xf32, #tpu.memory_space<vmem>>, vector<32x128xf32>
    %c160 = arith.constant 160 : index
    %c0_10 = arith.constant 0 : index
    %14 = vector.load %arg2[%c160, %c0_10] : memref<168x128xf32, #tpu.memory_space<vmem>>, vector<8x128xf32>
    %15 = vector.extract_strided_slice %14 {offsets = [0, 0], sizes = [1, 128], strides = [1, 1]} : vector<8x128xf32> to vector<1x128xf32>
    %16 = vector.extract_strided_slice %14 {offsets = [1, 0], sizes = [1, 128], strides = [1, 1]} : vector<8x128xf32> to vector<1x128xf32>
    %17 = vector.extract_strided_slice %14 {offsets = [2, 0], sizes = [1, 128], strides = [1, 1]} : vector<8x128xf32> to vector<1x128xf32>
    %18 = vector.extract_strided_slice %14 {offsets = [3, 0], sizes = [1, 128], strides = [1, 1]} : vector<8x128xf32> to vector<1x128xf32>
    %cst = arith.constant dense<0.000000e+00> : vector<1x128xf32>
    %19 = tpu.matmul %8, %9, %cst {dimension_numbers = #tpu.dot_dimension_numbers<[1], [0], [0], [1], [0, 0, 1, 1], [], []>} : vector<1x32xf32>, vector<32x128xf32>, vector<1x128xf32> -> vector<1x128xf32>
    %20 = arith.addf %19, %15 : vector<1x128xf32>
    %cst_11 = arith.constant dense<0.000000e+00> : vector<1x128xf32>
    %21 = tpu.matmul %7, %10, %cst_11 {dimension_numbers = #tpu.dot_dimension_numbers<[1], [0], [0], [1], [0, 0, 1, 1], [], []>} : vector<1x32xf32>, vector<32x128xf32>, vector<1x128xf32> -> vector<1x128xf32>
    %22 = arith.addf %21, %16 : vector<1x128xf32>
    %23 = vector.extract_strided_slice %20 {offsets = [0, 96], sizes = [1, 20], strides = [1, 1]} : vector<1x128xf32> to vector<1x20xf32>
    %24 = vector.extract_strided_slice %22 {offsets = [0, 32], sizes = [1, 20], strides = [1, 1]} : vector<1x128xf32> to vector<1x20xf32>
    %25 = arith.addf %23, %24 : vector<1x20xf32>
    %cst_12 = arith.constant dense<0xFF800000> : vector<1xf32>
    %26 = vector.multi_reduction <maximumf>, %25, %cst_12 [1] : vector<1x20xf32> to vector<1xf32>
    %27 = vector.shape_cast %26 : vector<1xf32> to vector<1x1xf32>
    %28 = vector.broadcast %27 : vector<1x1xf32> to vector<1x20xf32>
    %29 = arith.subf %25, %28 : vector<1x20xf32>
    %30 = math.exp %29 : vector<1x20xf32>
    %cst_13 = arith.constant dense<0.000000e+00> : vector<1xf32>
    %31 = vector.multi_reduction <add>, %30, %cst_13 [1] : vector<1x20xf32> to vector<1xf32>
    %32 = vector.shape_cast %31 : vector<1xf32> to vector<1x1xf32>
    %33 = vector.broadcast %32 : vector<1x1xf32> to vector<1x20xf32>
    %34 = arith.divf %30, %33 : vector<1x20xf32>
    %c0_14 = arith.constant 0 : index
    %c0_15 = arith.constant 0 : index
    %35 = vector.load %arg4[%c0_14, %c0_15] : memref<20x32xf32, #tpu.memory_space<vmem>>, vector<20x32xf32>
    %cst_16 = arith.constant dense<0.000000e+00> : vector<1x32xf32>
    %36 = tpu.matmul %34, %35, %cst_16 {dimension_numbers = #tpu.dot_dimension_numbers<[1], [0], [0], [1], [0, 0, 1, 1], [], []>} : vector<1x20xf32>, vector<20x32xf32>, vector<1x32xf32> -> vector<1x32xf32>
    %37 = vector.extract_strided_slice %22 {offsets = [0, 0], sizes = [1, 32], strides = [1, 1]} : vector<1x128xf32> to vector<1x32xf32>
    %cst_17 = arith.constant dense<0.000000e+00> : vector<1x128xf32>
    %38 = tpu.matmul %36, %12, %cst_17 {dimension_numbers = #tpu.dot_dimension_numbers<[1], [0], [0], [1], [0, 0, 1, 1], [], []>} : vector<1x32xf32>, vector<32x128xf32>, vector<1x128xf32> -> vector<1x128xf32>
    %39 = vector.extract_strided_slice %38 {offsets = [0, 0], sizes = [1, 32], strides = [1, 1]} : vector<1x128xf32> to vector<1x32xf32>
    %40 = arith.addf %37, %39 : vector<1x32xf32>
    %cst_18 = arith.constant 0.000000e+00 : f32
    %41 = vector.broadcast %cst_18 : f32 to vector<1x32xf32>
    %42 = arith.maximumf %40, %41 : vector<1x32xf32>
    %cst_19 = arith.constant dense<0.000000e+00> : vector<1x128xf32>
    %43 = tpu.matmul %42, %11, %cst_19 {dimension_numbers = #tpu.dot_dimension_numbers<[1], [0], [0], [1], [0, 0, 1, 1], [], []>} : vector<1x32xf32>, vector<32x128xf32>, vector<1x128xf32> -> vector<1x128xf32>
    %44 = arith.addf %43, %17 : vector<1x128xf32>
    %45 = vector.extract_strided_slice %44 {offsets = [0, 0], sizes = [1, 32], strides = [1, 1]} : vector<1x128xf32> to vector<1x32xf32>
    %46 = vector.extract_strided_slice %20 {offsets = [0, 0], sizes = [1, 32], strides = [1, 1]} : vector<1x128xf32> to vector<1x32xf32>
    %47 = arith.addf %45, %46 : vector<1x32xf32>
    %48 = arith.negf %47 : vector<1x32xf32>
    %49 = math.exp %48 : vector<1x32xf32>
    %cst_20 = arith.constant 1.000000e+00 : f32
    %50 = vector.broadcast %cst_20 : f32 to vector<1x32xf32>
    %51 = arith.addf %50, %49 : vector<1x32xf32>
    %52 = arith.divf %50, %51 : vector<1x32xf32>
    %53 = vector.extract_strided_slice %44 {offsets = [0, 32], sizes = [1, 32], strides = [1, 1]} : vector<1x128xf32> to vector<1x32xf32>
    %54 = vector.extract_strided_slice %20 {offsets = [0, 32], sizes = [1, 32], strides = [1, 1]} : vector<1x128xf32> to vector<1x32xf32>
    %55 = arith.addf %53, %54 : vector<1x32xf32>
    %56 = arith.negf %55 : vector<1x32xf32>
    %57 = math.exp %56 : vector<1x32xf32>
    %cst_21 = arith.constant 1.000000e+00 : f32
    %58 = vector.broadcast %cst_21 : f32 to vector<1x32xf32>
    %59 = arith.addf %58, %57 : vector<1x32xf32>
    %60 = arith.divf %58, %59 : vector<1x32xf32>
    %61 = vector.extract_strided_slice %44 {offsets = [0, 64], sizes = [1, 32], strides = [1, 1]} : vector<1x128xf32> to vector<1x32xf32>
    %62 = vector.extract_strided_slice %20 {offsets = [0, 64], sizes = [1, 32], strides = [1, 1]} : vector<1x128xf32> to vector<1x32xf32>
    %63 = arith.mulf %52, %62 : vector<1x32xf32>
    %64 = arith.addf %61, %63 : vector<1x32xf32>
    %65 = math.tanh %64 : vector<1x32xf32>
    %cst_22 = arith.constant 1.000000e+00 : f32
    %66 = vector.broadcast %cst_22 : f32 to vector<1x32xf32>
    %67 = arith.subf %66, %60 : vector<1x32xf32>
    %68 = arith.mulf %67, %65 : vector<1x32xf32>
    %69 = arith.mulf %60, %8 : vector<1x32xf32>
    %70 = arith.addf %68, %69 : vector<1x32xf32>
    %c0_23 = arith.constant 0 : index
    %c0_24 = arith.constant 0 : index
    %71 = vector.load %arg7[%c0_23, %c0_24] : memref<1x32xf32, #tpu.memory_space<vmem>>, vector<1x32xf32>
    tpu.vector_store %arg7[%c0_23, %c0_24], %70 {strides = array<i32>} : memref<1x32xf32, #tpu.memory_space<vmem>>, vector<1x32xf32>,
    %cst_25 = arith.constant dense<0.000000e+00> : vector<1x128xf32>
    %72 = tpu.matmul %70, %13, %cst_25 {dimension_numbers = #tpu.dot_dimension_numbers<[1], [0], [0], [1], [0, 0, 1, 1], [], []>} : vector<1x32xf32>, vector<32x128xf32>, vector<1x128xf32> -> vector<1x128xf32>
    %73 = arith.addf %72, %18 : vector<1x128xf32>
    %74 = vector.extract_strided_slice %73 {offsets = [0, 0], sizes = [1, 64], strides = [1, 1]} : vector<1x128xf32> to vector<1x64xf32>
    %cst_26 = arith.constant dense<0xFF800000> : vector<1xf32>
    %75 = vector.multi_reduction <maximumf>, %74, %cst_26 [1] : vector<1x64xf32> to vector<1xf32>
    %76 = vector.shape_cast %75 : vector<1xf32> to vector<1x1xf32>
    %77 = vector.broadcast %76 : vector<1x1xf32> to vector<1x64xf32>
    %78 = arith.subf %74, %77 : vector<1x64xf32>
    %79 = math.exp %78 : vector<1x64xf32>
    %cst_27 = arith.constant dense<0.000000e+00> : vector<1xf32>
    %80 = vector.multi_reduction <add>, %79, %cst_27 [1] : vector<1x64xf32> to vector<1xf32>
    %81 = vector.shape_cast %80 : vector<1xf32> to vector<1x1xf32>
    %82 = math.log %81 : vector<1x1xf32>
    %83 = vector.broadcast %82 : vector<1x1xf32> to vector<1x64xf32>
    %84 = arith.subf %78, %83 : vector<1x64xf32>
    %cst_28 = arith.constant 0.000000e+00 : f32
    %85 = vector.broadcast %cst_28 : f32 to vector<1x12xf32>
    %86 = tpu.concatenate %84, %70, %34, %85 in 1 : vector<1x64xf32>, vector<1x32xf32>, vector<1x20xf32>, vector<1x12xf32> -> vector<1x128xf32>
    %87 = vector.shape_cast %86 : vector<1x128xf32> to vector<1x1x128xf32>
    %c0_29 = arith.constant 0 : index
    %c0_30 = arith.constant 0 : index
    %c0_31 = arith.constant 0 : index
    %88 = vector.load %arg6[%c0_29, %c0_30, %c0_31] : memref<1x1x128xf32, #tpu.memory_space<vmem>>, vector<1x1x128xf32>
    tpu.vector_store %arg6[%c0_29, %c0_30, %c0_31], %87 {strides = array<i32>} : memref<1x1x128xf32, #tpu.memory_space<vmem>>, vector<1x1x128xf32>,
    return
  }
  func.func @transform_0(%arg0: i32, %arg1: memref<8xi32, #tpu.memory_space<smem>>) -> (i32, i32) {
    %c0_i32 = arith.constant 0 : i32
    %c0_i32_0 = arith.constant 0 : i32
    %c0_i32_1 = arith.constant 0 : i32
    return %c0_i32, %c0_i32_0 : i32, i32
  }
  func.func @transform_1(%arg0: i32, %arg1: memref<8xi32, #tpu.memory_space<smem>>) -> (i32, i32, i32) {
    %c0_i32 = arith.constant 0 : i32
    %c0_i32_0 = arith.constant 0 : i32
    %c0_i32_1 = arith.constant 0 : i32
    %c0_i32_2 = arith.constant 0 : i32
    return %c0_i32, %c0_i32_0, %c0_i32_1 : i32, i32, i32
  }
  func.func @transform_2(%arg0: i32, %arg1: memref<8xi32, #tpu.memory_space<smem>>) -> (i32, i32) {
    %c0_i32 = arith.constant 0 : i32
    %c0_i32_0 = arith.constant 0 : i32
    %c0_i32_1 = arith.constant 0 : i32
    return %c0_i32, %c0_i32_0 : i32, i32
  }
  func.func @transform_3(%arg0: i32, %arg1: memref<8xi32, #tpu.memory_space<smem>>) -> (i32, i32) {
    %c0_i32 = arith.constant 0 : i32
    %c0_i32_0 = arith.constant 0 : i32
    %c0_i32_1 = arith.constant 0 : i32
    return %c0_i32, %c0_i32_0 : i32, i32
  }
  func.func @transform_4(%arg0: i32, %arg1: memref<8xi32, #tpu.memory_space<smem>>) -> (i32, i32, i32) {
    %c0_i32 = arith.constant 0 : i32
    %c0_i32_0 = arith.constant 0 : i32
    %c0_i32_1 = arith.constant 0 : i32
    return %arg0, %c0_i32, %c0_i32_0 : i32, i32, i32
  }
}

</mosaic_0001>

<bundles_post_ra>
// kernel: _decode_impl.1
= control target key start
LH: loop header
LB: loop body
LE: loop exit
PB: predicated region body
PF: predicated region fallthrough
CT: control target
= control target key end

     0   :  { %s657_s21 = smov [#allocation4]   ;;  %s769_s0 = inlined_call_operand.vmem [shape: s32[8], index: 0, kind: input, shape index: {}]   ;;  %s770_s1 = inlined_call_operand.hbm [shape: f32[168,128], index: 1, kind: input, shape index: {}]   ;;  %s771_s2 = inlined_call_operand.vmem [shape: f32[64,1,32], index: 2, kind: input, shape index: {}]   ;;  %s772_s3 = inlined_call_operand.vmem [shape: f32[20,32], index: 3, kind: input, shape index: {}]   ;;  %s773_s4 = inlined_call_operand.vmem [shape: f32[1,32], index: 4, kind: input, shape index: {}]   ;;  %s774_s5 = inlined_call_operand.vmem [shape: f32[8,1,128], index: 5, kind: output, shape index: {}]  }
   0x1   :  { %s11_s20 = sshll.u32 %s769_s0, 4  ;;  %s12_s20 = int_to_ptr.vmem [resolvable:$true] %s11_s20 }
   0x2   :  { %14 = dma.vmem_to_smem %s12_s20, 16, %s657_s21, [#allocation3] }
   0x3   :  { %647 = dma.done.wait [#allocation3], 16 }
   0x4   :  { %648 = vsyncadd [#allocation3], 4294967280 }
   0x5   :  { %17 = sfence }
   0x6   :  { %18 = vsyncpa [#allocation6], 0  ;;  %s697_s22 = smov 0  }
   0x7 LB: > { %s150_s0 = sshll.u32 %s770_s1, 4  ;;  %s544_s25 = sadd.s32 4294967295, %s655_s22   ;;  %s655_s22 = sphi %s697_s22, %s24_s22   ;;  %s151_s0 = int_to_ptr.hbm [resolvable:$true] %s150_s0 }
   0x8   : > { %p546_p0 = scmp.ge.s32.totalorder %s655_s22, 1  ;;  %p139_p1 = scmp.lt.s32.totalorder %s655_s22, 9 }
   0x9   : > { %p547_p2 = scmp.ne.s32.totalorder %s544_s25, 0  ;;  %p569_p3 = scmp.eq.s32.totalorder %s544_s25, 0 }
   0xa   : > { %p140_p4 = pnand %p546_p0, %p139_p1  ;;  %s658_s26 = smov [#allocation5]  }
   0xb   : > { %s152_s27 = sshll.u32 %s658_s26, 4  ;;  %s659_s28 = smov 128   ;;  %s153_s27 = int_to_ptr.vmem [resolvable:$true] %s152_s27 }
   0xc   : > { %p565_p5 = pneg %p140_p4  ;;  %s660_s29 = smov 8  }
   0xd   : > { %177 = sbr.rel (%p140_p4) target bundleno = 1865 (0x749), region = 36 }
   0xe   : > { %p566_p6 = pnand %p569_p3, %p565_p5 }
  0x10   : > { %568 = dma.hbm_to_vmem [thread:$0]  (!%p566_p6), %s151_s0, 2688, %s153_s27, [#allocation6], %s659_s28, %s659_s28, %s660_s29  }
  0x12   : > { %650 = dma.done.wait (%p569_p3), [#allocation6], 2688  }
  0x13   : > { %652 = vsyncadd (%p569_p3), [#allocation6], 4294964608  ;;  %p197_p7 = scmp.lt.s32.totalorder %s544_s25, 7  ;;  %203 = sbr.rel (%p547_p2) target bundleno = 26 (0x1a), region = 44 }
  0x15   : > { %s708_s30 = scalar_select %p197_p7, %s544_s25, 7 }
  0x17   : > { %s199_s8 = scalar_lea.vmem %s774_s5, %s708_s30 }
  0x18   : > { %v204_v0 = vld [vmem:[%s773_s4] sm:$0x1]  ;;  %vm205_vm0 = vcmask 253952  }
  0x19   : > { %206 = vst.msk [vmem:[#allocation2] sm:$0x1] %vm205_vm0, %v204_v0 }
  0x1a PF: > { %v218_v1 = vld [vmem:[#allocation5 + $0x38] sm:$0xff]  ;;  %v217_v2 = vld [vmem:[#allocation5 + $0x30] sm:$0xff]  ;;  %s207_s11 = sld [smem:[#allocation4 + %s544_s25]]  ;;  %v216_v5 = vld [vmem:[#allocation5 + $0x28] sm:$0xff]  ;;  %vm232_vm1 = vcmask 261120   ;;  %s661_s15 = smov 64  }
  0x1b   : > { %274 = vmatpush.msra.mxu1 %v218_v1  ;;  %v214_v3 = vld [vmem:[#allocation5 + $0x18] sm:$0xff]  ;;  %v213_v4 = vld [vmem:[#allocation5 + $0x10] sm:$0xff]  ;;  %v212_v6 = vld [vmem:[#allocation5 + $0x8] sm:$0xff]  ;;  %vm287_vm2 = vcmask 942848   ;;  %s662_s16 = smov 32   ;;  %vm298_vm3 = vcmask 155648  }
  0x1c   : > { %248 = vmatpush.msra.mxu0 %v214_v3  ;;  %v215_v7 = vld [vmem:[#allocation5 + $0x20] sm:$0xff]  ;;  %v319_v26 = vld [vmem:[%s772_s3 + $0x10] sm:$0xf]  ;;  %vm326_vm4 = vcmask 1043456   ;;  %v226_v41 = vld [vmem:[#allocation5 + $0x78] sm:$0xff]  ;;  %vm323_vm9 = vcmask 162816  }
  0x1d   : > { %275 = vmatpush.msra.mxu1 %v217_v2  ;;  %v211_v8 = vld [vmem:[#allocation5] sm:$0xff]  ;;  %553 = vmatpush.msk.msra.mxu2 %vm326_vm4, %v319_v26  ;;  %v225_v42 = vld [vmem:[#allocation5 + $0x70] sm:$0xff]  ;;  %v224_v43 = vld [vmem:[#allocation5 + $0x68] sm:$0xff]  ;;  %s663_s24 = smov 96   ;;  %vm447_vm14 = vcmask 253952   ;;  %vm473_vm15 = vcmask 516096  }
  0x1e   : > { %249 = vmatpush.msra.mxu0 %v213_v4  ;;  %v723_v11 = vld [vmem:[#allocation5 + $0xa0] sm:$0xff]  ;;  %365 = vmatpush.msra.mxu3 %v226_v41  ;;  %v222_v46 = vld [vmem:[#allocation5 + $0x58] sm:$0xff]  ;;  %v221_v47 = vld [vmem:[#allocation5 + $0x50] sm:$0xff]  ;;  %vm489_vm0 = vcmask 523264  }
  0x1f   : > { %276 = vmatpush.msra.mxu1 %v216_v5  ;;  %v257_v12 = vrot.slane %v723_v11, 1  ;;  %v318_v27 = vld [vmem:[%s772_s3 + $0x8] sm:$0xff]  ;;  %v317_v28 = vld [vmem:[%s772_s3] sm:$0xff]  ;;  %v375_v54 = vrot.slane %v723_v11, 2 }
  0x20   : > { %s208_s14 = scalar_lea.vmem %s771_s2, %s207_s11  ;;  %250 = vmatpush.msra.mxu0 %v212_v6  ;;  %v210_v9 = vld [vmem:[#allocation2] sm:$0x1]  ;;  %344 = vmatpush.msra.mxu2 %v318_v27  ;;  %v223_v45 = vld [vmem:[#allocation5 + $0x60] sm:$0xff]  ;;  %v220_v49 = vld [vmem:[#allocation5 + $0x48] sm:$0xff] }
  0x21   : > { %277 = vmatpush.msra.mxu1 %v215_v7  ;;  %v209_v10 = vld [vmem:[%s208_s14] sm:$0x1]  ;;  %366 = vmatpush.msra.mxu3 %v225_v42  ;;  %v219_v50 = vld [vmem:[#allocation5 + $0x40] sm:$0xff] }
  0x22   : > { %552 = vmatmul.msk.f32.vlgmr.msra.gmra.mxu1 %vm232_vm1, %v209_v10  ;;  %251 = vmatpush.msra.mxu0 %v211_v8 }
  0x23   : > { %551 = vmatmul.msk.f32.vlgmr.msra.gmra.mxu0 %vm232_vm1, %v210_v9  ;;  %345 = vmatpush.msra.mxu2 %v317_v28 }
  0x24   : > { %367 = vmatpush.msra.mxu3 %v224_v43 }
  0x25   : > { %392 = vmatpush.msrb.mxu2 %v222_v46 }
  0x26   : > { %368 = vmatpush.msra.mxu3 %v223_v45 }
  0x27   : > { %393 = vmatpush.msrb.mxu2 %v221_v47 }
  0x29   : > { %394 = vmatpush.msrb.mxu2 %v220_v49 }
  0x2b   : > { %395 = vmatpush.msrb.mxu2 %v219_v50 }
  0x9f   : > { %v279_v13 = vpop.f32.mrf.mxu1 }
  0xa0   : > { %v726_v14 = vadd.f32 %v279_v13, %v257_v12  ;;  %v253_v15 = vpop.f32.mrf.mxu0  ;;  %v586_v13 = vld [vmem:[#allocation2] ss:$0 sm:$0xff] }
  0xa1   : > { %v731_v16 = vadd.f32 %v253_v15, %v723_v11  ;;  %v229_v15 = vld [vmem:[#allocation5 + $0x90] sm:$0xff] }
  0xa2   : > { %283 = vrot.lane.b32.xlu0 %v726_v14, %s661_s15 }
 0x114   : > { %v284_v17 = vpop.permute.xlu0 %283 }
 0x115   : > { %v286_v18 = vadd.f32 %v284_v17, %v731_v16  ;;  %v227_v17 = vld [vmem:[#allocation5 + $0x80] sm:$0xff] }
 0x117   : > { %v288_v19 = vsel %vm287_vm2, %v286_v18, -inf  ;;  %vm493_vm2 = vcmask 949248  }
 0x118   : > { %289 = vmax.xlane.f32.xlu0 %v288_v19 }
 0x18b   : > { %v290_v20 = vpop.xlane.xlu0 %289 }
 0x18c   : > { %v291_v21 = vsub.f32 %v286_v18, %v290_v20 }
 0x18e   : > { %v292_v22 = vmul.f32 1.442695, %v291_v21 }
 0x190   : > { %587 = vpow2.f32 %v292_v22 }
 0x196   : > { %v588_v23 = vpop.eup %587 }
 0x197   : > { %295 = vrot.lane.b32.xlu1 %v588_v23, %s662_s16 }
 0x209   : > { %v296_v24 = vpop.permute.xlu1 %295 }
 0x20a   : > { %v299_v25 = vsel %vm298_vm3, %v296_v24, 0.0 }
 0x20b   : > { %300 = vadd.xlane.f32.xlu1 %v299_v25  ;;  %v449_v25 = vrot.slane %v723_v11, 3 }
 0x27e   : > { %v301_v29 = vpop.xlane.xlu1 %300 }
 0x27f   : > { %589 = vrcp.f32 %v301_v29  ;;  %v313_v33 = vand.u32 2147483648, %v301_v29  ;;  %v311_v35 = vand.u32 2147483647, %v301_v29  ;;  %vm307_vm6 = vweird.f32 %v301_v29 }
 0x281   : > { %v314_v37 = vor.u32 1.1754944e-38, %v313_v33  ;;  %vm312_vm8 = vcmp.eq.f32.partialorder %v311_v35, 8.507059e+37 }
 0x285   : > { %v590_v30 = vpop.eup %589 }
 0x286   : > { %v303_v31 = vmul.f32 %v590_v30, %v301_v29  ;;  %vm308_vm5 = vweird.f32 %v590_v30 }
 0x287   : > { %vm309_vm7 = vmor %vm307_vm6, %vm308_vm5 }
 0x288   : > { %v304_v32 = vsub.f32 1.0, %v303_v31 }
 0x28a   : > { %v305_v34 = vmul.f32 %v590_v30, %v304_v32 }
 0x28c   : > { %v306_v36 = vadd.f32 %v590_v30, %v305_v34 }
 0x28e   : > { %v310_v38 = vsel %vm309_vm7, %v590_v30, %v306_v36 }
 0x28f   : > { %v315_v39 = vsel %vm312_vm8, %v314_v37, %v310_v38 }
 0x290   : > { %v744_v40 = vmul.f32 %v588_v23, %v315_v39 }
 0x292   : > { %321 = vrot.lane.b32.xlu2 %v744_v40, %s662_s16 }
 0x29a   : > { %421 = vrot.lane.b32.xlu2 %v731_v16, %s661_s15 }
 0x2ec   : > { %v322_v44 = vpop.permute.xlu2 %321 }
 0x2ed   : > { %554 = vmatmul.msk.f32.vlgmr.msra.gmra.mxu2 %vm323_vm9, %v322_v44 }
 0x2f4   : > { %v422_v6 = vpop.permute.xlu2 %421 }
 0x370   : > { %v347_v48 = vpop.f32.mrf.mxu2 }
 0x371   : > { %555 = vmatmul.msk.f32.vlgmr.msra.gmra.mxu3 %vm232_vm1, %v347_v48 }
 0x3f4   : > { %v370_v51 = vpop.f32.mrf.mxu3 }
 0x3f5   : > { %v373_v52 = vadd.f32 %v370_v51, %v726_v14  ;;  %v230_v14 = vld [vmem:[#allocation5 + $0x98] sm:$0xff] }
 0x3f6   : > { %465 = vmatpush.msrb.mxu0 %v230_v14 }
 0x3f7   : > { %v374_v53 = vmax.f32 %v373_v52, 0.0 }
 0x3f8   : > { %466 = vmatpush.msrb.mxu0 %v229_v15 }
 0x3f9   : > { %556 = vmatmul.msk.f32.vlgmr.msrb.gmra.mxu2 %vm232_vm1, %v374_v53 }
 0x47c   : > { %v397_v55 = vpop.f32.mrf.mxu2 }
 0x47d   : > { %v398_v56 = vadd.f32 %v397_v55, %v375_v54 }
 0x47f   : > { %v400_v57 = vadd.f32 %v398_v56, %v731_v16  ;;  %v228_v16 = vld [vmem:[#allocation5 + $0x88] sm:$0xff] }
 0x480   : > { %467 = vmatpush.msrb.mxu0 %v228_v16 }
 0x481   : > { %v557_v58 = vmul.f32 -1.442695, %v400_v57 }
 0x482   : > { %468 = vmatpush.msrb.mxu0 %v227_v17 }
 0x483   : > { %591 = vpow2.f32 %v557_v58 }
 0x489   : > { %v592_v59 = vpop.eup %591 }
 0x48a   : > { %v404_v60 = vadd.f32 1.0, %v592_v59 }
 0x48c   : > { %593 = vrcp.f32 %v404_v60  ;;  %v416_v0 = vand.u32 2147483648, %v404_v60  ;;  %v414_v2 = vand.u32 2147483647, %v404_v60  ;;  %vm410_vm11 = vweird.f32 %v404_v60 }
 0x48e   : > { %v417_v4 = vor.u32 1.1754944e-38, %v416_v0  ;;  %vm415_vm13 = vcmp.eq.f32.partialorder %v414_v2, 8.507059e+37 }
 0x492   : > { %v594_v61 = vpop.eup %593 }
 0x493   : > { %v406_v62 = vmul.f32 %v594_v61, %v404_v60  ;;  %vm411_vm10 = vweird.f32 %v594_v61 }
 0x494   : > { %vm412_vm12 = vmor %vm410_vm11, %vm411_vm10 }
 0x495   : > { %v407_v63 = vsub.f32 1.0, %v406_v62 }
 0x497   : > { %v408_v1 = vmul.f32 %v594_v61, %v407_v63 }
 0x499   : > { %v409_v3 = vadd.f32 %v594_v61, %v408_v1 }
 0x49b   : > { %v413_v5 = vsel %vm412_vm12, %v594_v61, %v409_v3 }
 0x49c   : > { %v418_v7 = vsel %vm415_vm13, %v417_v4, %v413_v5 }
 0x49d   : > { %v424_v8 = vmul.f32 %v422_v6, %v418_v7  ;;  %v431_v19 = vsub.f32 1.0, %v418_v7 }
 0x49f   : > { %426 = vrot.lane.b32.xlu2 %v424_v8, %s661_s15 }
 0x4f9   : > { %v427_v9 = vpop.permute.xlu2 %426 }
 0x4fa   : > { %v429_v10 = vadd.f32 %v427_v9, %v398_v56 }
 0x4fc   : > { %595 = vtanh.f32 %v429_v10 }
 0x502   : > { %v596_v12 = vpop.eup %595 }
 0x503   : > { %433 = vrot.lane.b32.xlu2 %v596_v12, %s663_s24 }
 0x50b   : > { %438 = vrot.lane.b32.xlu2 %v586_v13, %s662_s16 }
 0x55d   : > { %v434_v18 = vpop.permute.xlu2 %433 }
 0x55e   : > { %v436_v21 = vmul.f32 %v434_v18, %v431_v19 }
 0x565   : > { %v439_v20 = vpop.permute.xlu2 %438 }
 0x566   : > { %v441_v22 = vmul.f32 %v439_v20, %v418_v7 }
 0x568   : > { %v442_v23 = vadd.f32 %v441_v22, %v436_v21 }
 0x56a   : > { %486 = vrot.lane.b32.xlu1 %v442_v23, %s662_s16  ;;  %444 = vrot.lane.b32.xlu2 %v442_v23, %s663_s24 }
 0x5c4   : > { %v445_v24 = vpop.permute.xlu2 %444 }
 0x5c5   : > { %448 = vst.msk [vmem:[#allocation2] sm:$0x1] %vm447_vm14, %v445_v24  ;;  %558 = vmatmul.msk.f32.vlgmr.msrb.gmra.mxu0 %vm232_vm1, %v445_v24  ;;  %vm491_vm1 = vcmask 785408  }
 0x5dc   : > { %v487_v37 = vpop.permute.xlu1 %486 }
 0x642   : > { %v470_v26 = vpop.f32.mrf.mxu0 }
 0x643   : > { %v471_v27 = vadd.f32 %v470_v26, %v449_v25 }
 0x645   : > { %v474_v28 = vsel %vm473_vm15, %v471_v27, -inf }
 0x646   : > { %475 = vmax.xlane.f32.xlu2 %v474_v28 }
 0x6b9   : > { %v476_v29 = vpop.xlane.xlu2 %475 }
 0x6ba   : > { %v477_v30 = vsub.f32 %v471_v27, %v476_v29 }
 0x6bc   : > { %v478_v31 = vmul.f32 1.442695, %v477_v30 }
 0x6be   : > { %597 = vpow2.f32 %v478_v31 }
 0x6c4   : > { %v598_v32 = vpop.eup %597 }
 0x6c5   : > { %v480_v33 = vsel %vm473_vm15, %v598_v32, 0.0 }
 0x6c6   : > { %481 = vadd.xlane.f32.xlu0 %v480_v33 }
 0x739   : > { %v482_v34 = vpop.xlane.xlu0 %481 }
 0x73a   : > { %599 = vlog2.f32 %v482_v34 }
 0x740   : > { %v600_v35 = vpop.eup %599 }
 0x741   : > { %v484_v36 = vmul.f32 0.6931472, %v600_v35 }
 0x743   : > { %v485_v11 = vsub.f32 %v477_v30, %v484_v36 }
 0x745   : > { %v490_v38 = vsel %vm489_vm0, %v485_v11, %v487_v37 }
 0x746   : > { %v492_v39 = vsel %vm491_vm1, %v490_v38, %v744_v40 }
 0x747   : > { %v494_v41 = vsel %vm493_vm2, %v492_v39, 0.0 }
 0x748   : > { %495 = vst [vmem:[%s199_s8] sm:$0x1] %v494_v41 }
 0x749 PF: > { %s24_s22 = sadd.s32 1, %s655_s22  }
 0x74a   : > { %p21_p8 = scmp.ge.s32.totalorder %s24_s22, 10  }
 0x74c   :  { %23 = sbr.rel (!%p21_p8) target bundleno = 7 (0x7), region = 73 }
 0x751   :  { %513 = vsyncpa [#allocation6], 1 }
 0x752   :  { %515 = vsyncpa [#allocation6 + $0x1], 1 }

</bundles_post_ra>
